<compile_context>
chip_gen: v7x
topology: tpu7x:2x2x1
jax: 0.10.0
libtpu: 0.0.40
codegen_flags: <defaults>
</compile_context>

<pallas_src>
import jax
import jax.numpy as jnp
from jax.experimental import pallas as pl
from jax.experimental.pallas import tpu as pltpu


def _normalize_kernel(x_ref, mean_ref, invstd_ref, o_ref):
    # x_ref:      [tn, td]  tile of flattened NCHW rows
    # mean_ref:   [1,  td]  per-channel mean expanded over H*W (this lane tile)
    # invstd_ref: [1,  td]  per-channel 1/std expanded over H*W (this lane tile)
    # o_ref:      [tn, td]  normalized output tile
    o_ref[...] = (x_ref[...] - mean_ref[...]) * invstd_ref[...]


def _vmem_budget_and_limit():
    """Per-generation VMEM sizing: ~40% of physical capacity for our pipeline
    buffers (clamped to [4, 32] MiB), plus headroom for compiler scratch."""
    cap = None
    try:
        cap = int(pltpu.get_tpu_info().vmem_capacity_bytes)
    except Exception:
        cap = None
    if not cap or cap <= 0:
        cap = 64 << 20  # smallest physical VMEM across v5e/v6e/v7x (per TC)
    budget = max(4 << 20, min(32 << 20, int(cap * 0.4)))
    limit = min(cap, budget + (8 << 20))
    return budget, limit


def _pick_tiles(n, d, itemsize, budget_bytes):
    """Choose (tn, td) so that double-buffered x + out tiles plus the
    double-buffered stat blocks fit inside budget_bytes."""
    # Lane (last-dim) tile: multiple of 128, 512-2048 sweet spot.
    td = d if d <= 2048 else 2048

    # Sublane packing for the row tile: 8 rows f32, 16 bf16, 32 int8/fp8.
    pack = max(8, 32 // max(1, itemsize))

    stat_bytes = 2 * 2 * td * itemsize        # mean + invstd, double-buffered
    per_row = 4 * td * itemsize               # x + out, double-buffered
    tn = max(1, (budget_bytes - stat_bytes) // per_row)
    tn = min(tn, n, 1024)

    if n > pack:
        if d <= td:
            # Single feature tile: cap tn so there are >= ~8 grid steps, which
            # keeps the pipeline busy and lets v7x's two TCs split the work.
            tn = min(tn, max(pack, -(-n // 8)))
        # Round DOWN to packing alignment (never exceeds the budget).
        tn = max(pack, (tn // pack) * pack)
    else:
        tn = n                                 # full-extent first-axis block
    return tn, td


def make_normalize(mean_c, std_c, h, w, dtype=jnp.float32):
    """Precompute flattened-axis mean / inv-std ONCE (outside the hot loop)."""
    hw = h * w
    mean_vec = jnp.repeat(jnp.asarray(mean_c, dtype), hw).reshape(1, -1)
    invstd_vec = jnp.repeat(1.0 / jnp.asarray(std_c, dtype), hw).reshape(1, -1)
    return mean_vec, invstd_vec


def normalize_forward(x_nchw, mean_vec, invstd_vec, *, tn=None, td=None,
                      min_pallas_bytes=256 << 10, donate_x=False):
    """(x - mean[c]) / std[c] over NCHW via a tiled, pipelined Pallas kernel."""
    N, C, H, W = x_nchw.shape
    D = C * H * W
    dt = x_nchw.dtype
    itemsize = jnp.dtype(dt).itemsize
    x_flat = x_nchw.reshape(N, D)             # same memory order as torch .view(N, -1)
    mean_vec = mean_vec.astype(dt)
    invstd_vec = invstd_vec.astype(dt)

    # Small-size fast path: fixed pallas_call overhead dwarfs tiny traffic;
    # let XLA fuse the elementwise op instead.
    if N * D * itemsize < min_pallas_bytes:
        return ((x_flat - mean_vec) * invstd_vec).reshape(N, C, H, W)

    budget, vmem_limit = _vmem_budget_and_limit()
    auto_tn, auto_td = _pick_tiles(N, D, itemsize, budget)
    tn = min(tn, N) if tn is not None else auto_tn
    td = min(td, D) if td is not None else auto_td

    extra = {"input_output_aliases": {0: 0}} if donate_x else {}

    out = pl.pallas_call(
        _normalize_kernel,
        out_shape=jax.ShapeDtypeStruct((N, D), dt),
        grid=(pl.cdiv(N, tn), pl.cdiv(D, td)),
        in_specs=[
            pl.BlockSpec((tn, td), lambda i, j: (i, j)),   # streamed x tile
            pl.BlockSpec((1, td), lambda i, j: (0, j)),    # mean slice (tiny)
            pl.BlockSpec((1, td), lambda i, j: (0, j)),    # inv-std slice (tiny)
        ],
        out_specs=pl.BlockSpec((tn, td), lambda i, j: (i, j)),
        compiler_params=pltpu.CompilerParams(
            dimension_semantics=("parallel", "parallel"),  # independent tiles
            vmem_limit_bytes=vmem_limit,
        ),
        **extra,
    )(x_flat, mean_vec, invstd_vec)
    return out.reshape(N, C, H, W)


if __name__ == "__main__":
    key = jax.random.PRNGKey(0)

    # cifar10 normalization constants (as passed to Normalize(mean, std)).
    mean_c = jnp.array([0.4914, 0.4822, 0.4465], dtype=jnp.float32)
    std_c = jnp.array([0.2471, 0.2435, 0.2616], dtype=jnp.float32)

    def reference(x):
        return (x - mean_c[None, :, None, None].astype(x.dtype)) / \
               std_c[None, :, None, None].astype(x.dtype)

    # --- Case 1: small cifar-like batch; force the Pallas path so the kernel
    #     itself is exercised (default threshold would take the fast path). ---
    N, C, H, W = 2, 3, 16, 16
    k1, k2 = jax.random.split(key)
    x_small = jax.random.uniform(k1, (N, C, H, W), dtype=jnp.float32)
    mv_s, iv_s = make_normalize(mean_c, std_c, H, W, dtype=x_small.dtype)
    y_small = normalize_forward(x_small, mv_s, iv_s, min_pallas_bytes=0)
    jax.block_until_ready(y_small)
    assert y_small.shape == x_small.shape
    assert jnp.allclose(y_small, reference(x_small), atol=1e-5, rtol=1e-5)

    # Default call takes the small-size fast path; must match too.
    y_fast = normalize_forward(x_small, mv_s, iv_s)
    jax.block_until_ready(y_fast)
    assert jnp.allclose(y_fast, reference(x_small), atol=1e-5, rtol=1e-5)

    # --- Case 2: slightly larger (still small) batch that exercises the 2-D
    #     (row, lane) tiling: D = 3*32*32 = 3072 > 2048 -> two feature tiles. ---
    N2, C2, H2, W2 = 16, 3, 32, 32
    x_big = jax.random.uniform(k2, (N2, C2, H2, W2), dtype=jnp.float32)
    mv_b, iv_b = make_normalize(mean_c, std_c, H2, W2, dtype=x_big.dtype)
    y_big = normalize_forward(x_big, mv_b, iv_b, min_pallas_bytes=0)
    jax.block_until_ready(y_big)
    assert jnp.allclose(y_big, reference(x_big), atol=1e-5, rtol=1e-5)

    print("KERNEL_OK")
</pallas_src>

<mosaic_0001>
module attributes {stable_mosaic.version = 11 : i64} {
  func.func @_normalize_kernel(%arg0: i32, %arg1: i32, %arg2: memref<2x768xf32, #tpu.memory_space<vmem>>, %arg3: memref<1x768xf32, #tpu.memory_space<vmem>>, %arg4: memref<1x768xf32, #tpu.memory_space<vmem>>, %arg5: memref<2x768xf32, #tpu.memory_space<vmem>>) attributes {dimension_semantics = [#tpu.dimension_semantics<parallel>, #tpu.dimension_semantics<parallel>], iteration_bounds = array<i64: 1, 1>, scalar_prefetch = 0 : i64, scratch_operands = 0 : i64, tpu.core_type = #tpu.core_type<tc>, window_params = [{transform_indices = @transform_0, window_bounds = array<i64: 2, 768>}, {transform_indices = @transform_1, window_bounds = array<i64: 1, 768>}, {transform_indices = @transform_2, window_bounds = array<i64: 1, 768>}, {transform_indices = @transform_3, window_bounds = array<i64: 2, 768>}]} {
    %c0 = arith.constant 0 : index
    %c0_0 = arith.constant 0 : index
    %0 = vector.load %arg2[%c0, %c0_0] : memref<2x768xf32, #tpu.memory_space<vmem>>, vector<2x768xf32>
    %c0_1 = arith.constant 0 : index
    %c0_2 = arith.constant 0 : index
    %1 = vector.load %arg3[%c0_1, %c0_2] : memref<1x768xf32, #tpu.memory_space<vmem>>, vector<1x768xf32>
    %2 = vector.broadcast %1 : vector<1x768xf32> to vector<2x768xf32>
    %3 = arith.subf %0, %2 : vector<2x768xf32>
    %c0_3 = arith.constant 0 : index
    %c0_4 = arith.constant 0 : index
    %4 = vector.load %arg4[%c0_3, %c0_4] : memref<1x768xf32, #tpu.memory_space<vmem>>, vector<1x768xf32>
    %5 = vector.broadcast %4 : vector<1x768xf32> to vector<2x768xf32>
    %6 = arith.mulf %3, %5 : vector<2x768xf32>
    %c0_5 = arith.constant 0 : index
    %c0_6 = arith.constant 0 : index
    %7 = vector.load %arg5[%c0_5, %c0_6] : memref<2x768xf32, #tpu.memory_space<vmem>>, vector<2x768xf32>
    tpu.vector_store %arg5[%c0_5, %c0_6], %6 {strides = array<i32>} : memref<2x768xf32, #tpu.memory_space<vmem>>, vector<2x768xf32>,
    return
  }
  func.func @transform_0(%arg0: i32, %arg1: i32) -> (i32, i32) {
    %c0_i32 = arith.constant 0 : i32
    return %arg0, %arg1 : i32, i32
  }
  func.func @transform_1(%arg0: i32, %arg1: i32) -> (i32, i32) {
    %c0_i32 = arith.constant 0 : i32
    %c0_i32_0 = arith.constant 0 : i32
    return %c0_i32, %arg1 : i32, i32
  }
  func.func @transform_2(%arg0: i32, %arg1: i32) -> (i32, i32) {
    %c0_i32 = arith.constant 0 : i32
    %c0_i32_0 = arith.constant 0 : i32
    return %c0_i32, %arg1 : i32, i32
  }
  func.func @transform_3(%arg0: i32, %arg1: i32) -> (i32, i32) {
    %c0_i32 = arith.constant 0 : i32
    return %arg0, %arg1 : i32, i32
  }
}

</mosaic_0001>

<bundles_post_ra>
// kernel: tpu_custom_call.1
= control target key start
LH: loop header
LB: loop body
LE: loop exit
PB: predicated region body
PF: predicated region fallthrough
CT: control target
= control target key end

     0   :  { %8 = vsyncpa [#allocation3], 0  ;;  %s308_s0 = inlined_call_operand.hbm [shape: f32[2,768], index: 0, kind: input, shape index: {}]   ;;  %s309_s1 = inlined_call_operand.hbm [shape: f32[1,768], index: 1, kind: input, shape index: {}]   ;;  %s310_s2 = inlined_call_operand.vmem [shape: f32[1,768], index: 2, kind: input, shape index: {}]   ;;  %s311_s3 = inlined_call_operand.hbm [shape: f32[2,768], index: 3, kind: output, shape index: {}]  }
   0x1   :  { %9 = vsyncpa [#allocation6], 0 }
   0x2   :  { %10 = vsyncpa [#allocation4], 0  ;;  %s245_s12 = smov [#allocation2]   ;;  %s246_s14 = smov [#allocation5]  }
   0x3   :  { %s17_s13 = sshll.u32 %s245_s12, 4  ;;  %s27_s15 = sshll.u32 %s246_s14, 4  ;;  %s18_s13 = int_to_ptr.vmem [resolvable:$true] %s17_s13  ;;  %s28_s15 = int_to_ptr.vmem [resolvable:$true] %s27_s15 }
   0x4   :  { %s173_s18 = scalar_lea.hbm %s308_s0, 192 }
   0x5   :  { %p174_p0 = scmp.ne.s32.totalorder %s308_s0, %s173_s18  ;;  %p177_p1 = scmp.lt.u32.totalorder %s173_s18, %s308_s0 }
   0x7   :  { %p179_p2 = pnand %p177_p1, %p174_p0 }
   0x9   :  { %182 = shalt.err (!%p179_p2)
}
   0xa   :  { %s183_s23 = scalar_lea.vmem %s18_s13, 192  ;;  %p188_p4 = scmp.lt.s32.totalorder %s18_s13, %s18_s13 }
   0xb   :  { %p184_p3 = scmp.ne.s32.totalorder %s18_s13, %s183_s23  ;;  %p189_p5 = scmp.lt.s32.totalorder %s183_s23, %s183_s23 }
   0xd   :  { %p190_p6 = por %p189_p5, %p188_p4 }
   0xf   :  { %p191_p7 = pnand %p190_p6, %p184_p3 }
  0x11   :  { %194 = shalt.err (!%p191_p7)
}
  0x12   :  { %20 = dma.hbm_to_vmem [thread:$0]  %s308_s0, 192, %s18_s13, [#allocation3]  }
  0x13   :  { %s195_s28 = scalar_lea.hbm %s309_s1, 96 }
  0x14   :  { %p196_p8 = scmp.ne.s32.totalorder %s309_s1, %s195_s28  ;;  %p199_p9 = scmp.lt.u32.totalorder %s195_s28, %s309_s1 }
  0x16   :  { %p201_p10 = pnand %p199_p9, %p196_p8 }
  0x18   :  { %204 = shalt.err (!%p201_p10)
}
  0x19   :  { %s205_s6 = scalar_lea.vmem %s28_s15, 96  ;;  %p210_p12 = scmp.lt.s32.totalorder %s28_s15, %s28_s15 }
  0x1a   :  { %p206_p11 = scmp.ne.s32.totalorder %s28_s15, %s205_s6  ;;  %p211_p13 = scmp.lt.s32.totalorder %s205_s6, %s205_s6 }
  0x1c   :  { %p212_p0 = por %p211_p13, %p210_p12 }
  0x1e   :  { %p213_p1 = pnand %p212_p0, %p206_p11 }
  0x20   :  { %216 = shalt.err (!%p213_p1)
}
  0x21   :  { %30 = dma.hbm_to_vmem [thread:$0]  %s309_s1, 96, %s28_s15, [#allocation6]  }
  0x22   :  { %239 = dma.done.wait [#allocation3], 192  }
  0x23   :  { %240 = vsyncadd [#allocation3], 4294967104 }
  0x24   :  { %241 = dma.done.wait [#allocation6], 96  }
  0x25   :  { %242 = vsyncadd [#allocation6], 4294967200  ;;  %v43_v0 = vlaneseq  ;;  %v247_v1 = vmov 1983009808   ;;  %v41_v11 = vld [vmem:[#allocation5] sm:$0x3f] }
  0x26   :  { %v70_v2 = vunpack.c.l.s4 %v247_v1  ;;  %v96_v13 = vld [vmem:[%s310_s2] sm:$0x3f]  ;;  %v40_v36 = vld [vmem:[#allocation2 + $0x8] sm:$0xf]  ;;  %s248_s1 = smov [#allocation7]  }
  0x27   :  { %v44_v3 = vshrl.u32 %v43_v0, 7  ;;  %v39_v33 = vld [vmem:[#allocation2] sm:$0xff]  ;;  %s159_s2 = sshll.u32 %s248_s1, 4  ;;  %s160_s2 = int_to_ptr.vmem [resolvable:$true] %s159_s2 }
  0x28   :  { %v71_v4 = vunpack.c.0.s8 %v70_v2  ;;  %s217_s10 = scalar_lea.vmem %s160_s2, 192  ;;  %p222_p3 = scmp.lt.s32.totalorder %s160_s2, %s160_s2 }
  0x29   :  { %v45_v5 = vsub.s32 0, %v44_v3  ;;  %v49_v6 = vsub.s32 1, %v44_v3  ;;  %v53_v7 = vsub.s32 2, %v44_v3  ;;  %v57_v8 = vsub.s32 3, %v44_v3  ;;  %p218_p2 = scmp.ne.s32.totalorder %s160_s2, %s217_s10  ;;  %p223_p4 = scmp.lt.s32.totalorder %s217_s10, %s217_s10 }
  0x2a   :  { %v61_v9 = vsub.s32 4, %v44_v3  ;;  %v65_v10 = vsub.s32 5, %v44_v3  ;;  %v74_v12 = vsub.s32 %v71_v4, %v44_v3 }
  0x2b   :  { %v46_v14 = vrot.slane %v41_v11, %v45_v5  ;;  %v50_v15 = vrot.slane %v41_v11, %v49_v6  ;;  %v54_v16 = vrot.slane %v41_v11, %v53_v7  ;;  %v58_v17 = vrot.slane %v41_v11, %v57_v8  ;;  %p224_p5 = por %p223_p4, %p222_p3 }
  0x2c   :  { %v101_v18 = vrot.slane %v96_v13, %v45_v5  ;;  %v105_v19 = vrot.slane %v96_v13, %v49_v6  ;;  %v109_v20 = vrot.slane %v96_v13, %v53_v7  ;;  %v113_v21 = vrot.slane %v96_v13, %v57_v8 }
  0x2d   :  { %v67_v22 = vcombine.low %v46_v14, %v50_v15  ;;  %v68_v23 = vcombine.low %v54_v16, %v58_v17  ;;  %v62_v24 = vrot.slane %v41_v11, %v61_v9  ;;  %v66_v25 = vrot.slane %v41_v11, %v65_v10  ;;  %p225_p6 = pnand %p224_p5, %p218_p2 }
  0x2e   :  { %v122_v26 = vcombine.low %v101_v18, %v105_v19  ;;  %v123_v27 = vcombine.low %v109_v20, %v113_v21  ;;  %v117_v28 = vrot.slane %v96_v13, %v61_v9  ;;  %v121_v29 = vrot.slane %v96_v13, %v65_v10 }
  0x2f   :  { %v75_v30 = vrot.slane %v67_v22, %v74_v12  ;;  %v82_v31 = vrot.slane %v68_v23, %v74_v12  ;;  %v84_v32 = vcombine.low %v62_v24, %v66_v25 }
  0x30   :  { %v130_v34 = vrot.slane %v122_v26, %v74_v12  ;;  %v137_v35 = vrot.slane %v123_v27, %v74_v12  ;;  %v139_v37 = vcombine.low %v117_v28, %v121_v29 }
  0x31   :  { %v83_v38 = vcombine.low %v75_v30, %v82_v31  ;;  %v91_v39 = vrot.slane %v84_v32, %v74_v12 }
  0x32   :  { %v138_v40 = vcombine.low %v130_v34, %v137_v35  ;;  %v146_v41 = vrot.slane %v139_v37, %v74_v12 }
  0x33   :  { %v94_v42 = vsub.f32 %v39_v33, %v83_v38  ;;  %v95_v43 = vsub.f32 %v40_v36, %v91_v39 }
  0x35   :  { %v149_v44 = vmul.f32 %v138_v40, %v94_v42  ;;  %v150_v45 = vmul.f32 %v146_v41, %v95_v43 }
  0x37   :  { %151 = vst [vmem:[#allocation7] sm:$0xff] %v149_v44  ;;  %152 = vst [vmem:[#allocation7 + $0x8] sm:$0xf] %v150_v45 }
  0x38   :  { %228 = shalt.err (!%p225_p6)
}
  0x39   :  { %s229_s13 = scalar_lea.hbm %s311_s3, 192 }
  0x3a   :  { %p230_p7 = scmp.ne.s32.totalorder %s311_s3, %s229_s13  ;;  %p233_p8 = scmp.lt.u32.totalorder %s229_s13, %s311_s3 }
  0x3c   :  { %p235_p9 = pnand %p233_p8, %p230_p7 }
  0x3e   :  { %238 = shalt.err (!%p235_p9)
}
  0x3f   :  { %162 = dma.vmem_to_hbm [thread:$0]  %s160_s2, 192, %s311_s3, [#allocation4]  }
  0x40   :  { %243 = dma.done.wait [#allocation4], 192  }
  0x41   :  { %244 = vsyncadd [#allocation4], 4294967104 }
  0x42   :  { %166 = vsyncpa [#allocation3], 1 }
  0x43   :  { %167 = vsyncpa [#allocation6], 1 }
  0x44   :  { %168 = vsyncpa [#allocation4], 1 }

</bundles_post_ra>
